<compile_context>
chip_gen: v7x
topology: tpu7x:2x2x1
jax: 0.10.0
libtpu: 0.0.40
codegen_flags: <defaults>
</compile_context>

<pallas_src>
import functools

import jax
import jax.numpy as jnp
from jax.experimental import pallas as pl
from jax.experimental.pallas import tpu as pltpu


# ----------------------------- Pallas kernels -------------------------------

def _interp_kernel(x_ref, w_ref, o_ref):
    # x: (TM, Din), w: (Din, Dout), o: (TM, Dout)
    o_ref[...] = jnp.dot(x_ref[...], w_ref[...],
                         preferred_element_type=jnp.float32).astype(o_ref.dtype)


def _interp_gated_kernel(x_ref, w_ref, m_ref, o_ref):
    # x: (TM, Din), w: (Din, Dout), m: (1, Dout), o: (TM, Dout)
    y = jnp.dot(x_ref[...], w_ref[...], preferred_element_type=jnp.float32)
    gate = 2.0 / (1.0 + jnp.exp(-m_ref[...]))          # 2 * sigmoid(mask), fused
    o_ref[...] = (y * gate).astype(o_ref.dtype)


# ----------------------------- pallas_call wrapper ---------------------------

def _interpolate_rows(x2, W, mask=None):
    """x2: [N, Din] -> [N, Dout] via one fused Pallas kernel."""
    N, Din = x2.shape
    Dout = W.shape[1]

    # Single full block for small N; 256-row tiles (parallel grid) for large N.
    TM = N if N <= 512 else 256
    grid = (pl.cdiv(N, TM),)

    x_spec = pl.BlockSpec((TM, Din), lambda i: (i, 0))
    o_spec = pl.BlockSpec((TM, Dout), lambda i: (i, 0))
    w_spec = pl.BlockSpec((Din, Dout), lambda i: (0, 0))
    cparams = pltpu.CompilerParams(dimension_semantics=("parallel",))

    if mask is None:
        return pl.pallas_call(
            _interp_kernel,
            out_shape=jax.ShapeDtypeStruct((N, Dout), x2.dtype),
            grid=grid,
            in_specs=[x_spec, w_spec],
            out_specs=o_spec,
            compiler_params=cparams,
        )(x2, W)

    m2 = mask.reshape(1, Dout).astype(jnp.float32)
    m_spec = pl.BlockSpec((1, Dout), lambda i: (0, 0))
    return pl.pallas_call(
        _interp_gated_kernel,
        out_shape=jax.ShapeDtypeStruct((N, Dout), x2.dtype),
        grid=grid,
        in_specs=[x_spec, w_spec, m_spec],
        out_specs=o_spec,
        compiler_params=cparams,
    )(x2, W, m2)


# ----------------------------- Parameter packing -----------------------------

def make_interp_matrix(in_size, out_size, dtype=jnp.float32):
    """[Din, Dout] matrix implementing linear interpolation, align_corners=True.

    Built once at init (outside the jitted forward) so the steady-state forward
    is a single matmul kernel.
    """
    if out_size == 1:
        pos = jnp.zeros((1,), jnp.float32)        # torch: out==1 -> sample index 0
    else:
        pos = jnp.linspace(0.0, float(in_size - 1), out_size, dtype=jnp.float32)
    i0 = jnp.clip(jnp.floor(pos), 0.0, float(in_size - 1)).astype(jnp.int32)
    i1 = jnp.minimum(i0 + 1, in_size - 1)
    frac = pos - i0.astype(jnp.float32)
    rows = jnp.arange(in_size, dtype=jnp.int32)[:, None]
    W = ((rows == i0[None, :]).astype(jnp.float32) * (1.0 - frac)[None, :]
         + (rows == i1[None, :]).astype(jnp.float32) * frac[None, :])
    return W.astype(dtype)


def init_tdi_params(key, in_size, output_size, trainable=False):
    params = {"W": make_interp_matrix(in_size, output_size)}
    if trainable:
        # nn.Parameter(torch.zeros(output_size)) in the module; use small random
        # values here so the gate path is actually exercised.
        params["mask"] = 0.5 * jax.random.normal(key, (output_size,), jnp.float32)
    return params


# ----------------------------- Forward ---------------------------------------

def tdi_forward(params, x, *, output_size, batch_first=False, trainable=False):
    mask = params["mask"] if trainable else None
    W = params["W"]

    if x.ndim <= 2:
        # TODO(synk): 1-D input errors in the original torch code; only the 2-D
        # path is meaningful and is what is implemented here.
        x2 = x.reshape(-1, x.shape[-1])
        y = _interpolate_rows(x2, W, mask)
        return y.reshape(x.shape[:-1] + (output_size,))

    x2 = x.reshape(-1, x.shape[-1])
    y = _interpolate_rows(x2, W, mask)
    if batch_first:
        return y.reshape(x.shape[0], -1, output_size)
    return y.reshape(-1, x.shape[1], output_size)


# ----------------------------- Pure-JAX reference ----------------------------

def tdi_reference(x, output_size, batch_first=False, mask=None):
    in_size = x.shape[-1]
    x2 = x.reshape(-1, in_size)
    if output_size == 1:
        pos = jnp.zeros((1,), jnp.float32)
    else:
        pos = jnp.linspace(0.0, float(in_size - 1), output_size, dtype=jnp.float32)
    i0 = jnp.clip(jnp.floor(pos), 0.0, float(in_size - 1)).astype(jnp.int32)
    i1 = jnp.minimum(i0 + 1, in_size - 1)
    frac = (pos - i0.astype(jnp.float32)).astype(x.dtype)
    y = x2[:, i0] * (1.0 - frac)[None, :] + x2[:, i1] * frac[None, :]
    if mask is not None:
        y = y * (2.0 * jax.nn.sigmoid(mask))[None, :]
    if x.ndim <= 2:
        return y.reshape(x.shape[:-1] + (output_size,))
    if batch_first:
        return y.reshape(x.shape[0], -1, output_size)
    return y.reshape(-1, x.shape[1], output_size)


# ----------------------------- Main -------------------------------------------

if __name__ == "__main__":
    B, T, Din, Dout = 2, 8, 16, 128   # Dout=128 -> lane-dense output slab

    key = jax.random.PRNGKey(0)
    kx3, kx2, km = jax.random.split(key, 3)
    x3 = jax.random.normal(kx3, (B, T, Din), jnp.float32)   # time-distributed input
    x2 = jax.random.normal(kx2, (5, Din), jnp.float32)      # "<= 2 dims" path

    params_plain = init_tdi_params(km, Din, Dout, trainable=False)
    params_train = init_tdi_params(km, Din, Dout, trainable=True)

    fwd_plain = jax.jit(functools.partial(
        tdi_forward, output_size=Dout, batch_first=True, trainable=False))
    fwd_train = jax.jit(functools.partial(
        tdi_forward, output_size=Dout, batch_first=False, trainable=True))

    y_a = jax.block_until_ready(fwd_plain(params_plain, x3))   # non-trainable, batch_first
    y_b = jax.block_until_ready(fwd_train(params_train, x3))   # trainable gate, batch_first=False
    y_c = jax.block_until_ready(fwd_plain(params_plain, x2))   # 2-D input path

    r_a = tdi_reference(x3, Dout, batch_first=True, mask=None)
    r_b = tdi_reference(x3, Dout, batch_first=False, mask=params_train["mask"])
    r_c = tdi_reference(x2, Dout, batch_first=True, mask=None)

    assert y_a.shape == (B, T, Dout), y_a.shape
    assert y_b.shape == (B, T, Dout), y_b.shape
    assert y_c.shape == (5, Dout), y_c.shape
    for y, r in ((y_a, r_a), (y_b, r_b), (y_c, r_c)):
        assert y.shape == r.shape, (y.shape, r.shape)
        assert bool(jnp.all(jnp.isfinite(y)))
        assert bool(jnp.allclose(y, r, rtol=1e-5, atol=1e-5)), \
            float(jnp.max(jnp.abs(y - r)))

    print("KERNEL_OK")
</pallas_src>

<mosaic_0001>
module attributes {stable_mosaic.version = 11 : i64} {
  func.func @_interp_kernel(%arg0: i32, %arg1: memref<16x16xf32, #tpu.memory_space<vmem>>, %arg2: memref<16x128xf32, #tpu.memory_space<vmem>>, %arg3: memref<16x128xf32, #tpu.memory_space<vmem>>) attributes {dimension_semantics = [#tpu.dimension_semantics<parallel>], iteration_bounds = array<i64: 1>, scalar_prefetch = 0 : i64, scratch_operands = 0 : i64, tpu.core_type = #tpu.core_type<tc>, window_params = [{transform_indices = @transform_0, window_bounds = array<i64: 16, 16>}, {pipeline_mode = #tpu.pipeline_mode<synchronous>, transform_indices = @transform_1, window_bounds = array<i64: 16, 128>}, {transform_indices = @transform_2, window_bounds = array<i64: 16, 128>}]} {
    %c0 = arith.constant 0 : index
    %c0_0 = arith.constant 0 : index
    %0 = vector.load %arg1[%c0, %c0_0] : memref<16x16xf32, #tpu.memory_space<vmem>>, vector<16x16xf32>
    %c0_1 = arith.constant 0 : index
    %c0_2 = arith.constant 0 : index
    %1 = vector.load %arg2[%c0_1, %c0_2] : memref<16x128xf32, #tpu.memory_space<vmem>>, vector<16x128xf32>
    %cst = arith.constant dense<0.000000e+00> : vector<16x128xf32>
    %2 = tpu.matmul %0, %1, %cst {dimension_numbers = #tpu.dot_dimension_numbers<[1], [0], [0], [1], [0, 0, 1, 1], [], []>} : vector<16x16xf32>, vector<16x128xf32>, vector<16x128xf32> -> vector<16x128xf32>
    %c0_3 = arith.constant 0 : index
    %c0_4 = arith.constant 0 : index
    %3 = vector.load %arg3[%c0_3, %c0_4] : memref<16x128xf32, #tpu.memory_space<vmem>>, vector<16x128xf32>
    tpu.vector_store %arg3[%c0_3, %c0_4], %2 {strides = array<i32>} : memref<16x128xf32, #tpu.memory_space<vmem>>, vector<16x128xf32>,
    return
  }
  func.func @transform_0(%arg0: i32) -> (i32, i32) {
    %c0_i32 = arith.constant 0 : i32
    %c0_i32_0 = arith.constant 0 : i32
    return %arg0, %c0_i32 : i32, i32
  }
  func.func @transform_1(%arg0: i32) -> (i32, i32) {
    %c0_i32 = arith.constant 0 : i32
    %c0_i32_0 = arith.constant 0 : i32
    %c0_i32_1 = arith.constant 0 : i32
    return %c0_i32, %c0_i32_0 : i32, i32
  }
  func.func @transform_2(%arg0: i32) -> (i32, i32) {
    %c0_i32 = arith.constant 0 : i32
    %c0_i32_0 = arith.constant 0 : i32
    return %arg0, %c0_i32 : i32, i32
  }
}

</mosaic_0001>

<bundles_post_ra>
// kernel: tdi_forward.1
= control target key start
LH: loop header
LB: loop body
LE: loop exit
PB: predicated region body
PF: predicated region fallthrough
CT: control target
= control target key end

     0   :  { %7 = vsyncpa [#allocation3], 0  ;;  %s305_s0 = inlined_call_operand.hbm [shape: f32[16,16], index: 0, kind: input, shape index: {}]   ;;  %s306_s1 = inlined_call_operand.hbm [shape: f32[16,128], index: 1, kind: input, shape index: {}]   ;;  %s307_s2 = inlined_call_operand.hbm [shape: f32[16,128], index: 2, kind: output, shape index: {}]  }
   0x1   :  { %8 = vsyncpa [#allocation6], 0 }
   0x2   :  { %9 = vsyncpa [#allocation4], 0  ;;  %s240_s9 = smov [#allocation2]   ;;  %s168_s13 = scalar_lea.hbm %s305_s0, 256 }
   0x3   :  { %s15_s10 = sshll.u32 %s240_s9, 4  ;;  %p169_p0 = scmp.ne.s32.totalorder %s305_s0, %s168_s13  ;;  %s16_s10 = int_to_ptr.vmem [resolvable:$true] %s15_s10 }
   0x4   :  { %p172_p1 = scmp.lt.u32.totalorder %s168_s13, %s305_s0 }
   0x6   :  { %p174_p2 = pnand %p172_p1, %p169_p0 }
   0x8   :  { %177 = shalt.err (!%p174_p2)
}
   0x9   :  { %s178_s18 = scalar_lea.vmem %s16_s10, 256  ;;  %p183_p4 = scmp.lt.s32.totalorder %s16_s10, %s16_s10 }
   0xa   :  { %p179_p3 = scmp.ne.s32.totalorder %s16_s10, %s178_s18  ;;  %p184_p5 = scmp.lt.s32.totalorder %s178_s18, %s178_s18 }
   0xc   :  { %p185_p6 = por %p184_p5, %p183_p4 }
   0xe   :  { %p186_p7 = pnand %p185_p6, %p179_p3 }
  0x10   :  { %189 = shalt.err (!%p186_p7)
}
  0x11   :  { %s241_s19 = smov 128   ;;  %s242_s20 = smov 8  }
  0x12   :  { %21 = dma.hbm_to_vmem [thread:$0]  %s305_s0, 256, %s16_s10, [#allocation3], %s241_s19, %s241_s19, %s242_s20  }
  0x13   :  { %s243_s23 = smov [#allocation5]   ;;  %s190_s27 = scalar_lea.hbm %s306_s1, 256 }
  0x14   :  { %s27_s24 = sshll.u32 %s243_s23, 4  ;;  %p191_p8 = scmp.ne.s32.totalorder %s306_s1, %s190_s27  ;;  %s28_s24 = int_to_ptr.vmem [resolvable:$true] %s27_s24 }
  0x15   :  { %p194_p9 = scmp.lt.u32.totalorder %s190_s27, %s306_s1 }
  0x17   :  { %p196_p10 = pnand %p194_p9, %p191_p8 }
  0x19   :  { %199 = shalt.err (!%p196_p10)
}
  0x1a   :  { %s200_s4 = scalar_lea.vmem %s28_s24, 256  ;;  %p205_p12 = scmp.lt.s32.totalorder %s28_s24, %s28_s24 }
  0x1b   :  { %p201_p11 = scmp.ne.s32.totalorder %s28_s24, %s200_s4  ;;  %p206_p13 = scmp.lt.s32.totalorder %s200_s4, %s200_s4 }
  0x1d   :  { %p207_p0 = por %p206_p13, %p205_p12 }
  0x1f   :  { %p208_p1 = pnand %p207_p0, %p201_p11 }
  0x21   :  { %211 = shalt.err (!%p208_p1)
}
  0x22   :  { %33 = dma.hbm_to_vmem [thread:$0]  %s306_s1, 256, %s28_s24, [#allocation6], %s241_s19, %s241_s19, %s242_s20  }
  0x23   :  { %234 = dma.done.wait [#allocation3], 256  }
  0x24   :  { %235 = vsyncadd [#allocation3], 4294967040 }
  0x25   :  { %236 = dma.done.wait [#allocation6], 256  }
  0x26   :  { %237 = vsyncadd [#allocation6], 4294967040  ;;  %vm44_vm0 = vcmask 130048   ;;  %v42_v0 = vld [vmem:[#allocation5] sm:$0xff]  ;;  %v43_v1 = vld [vmem:[#allocation5 + $0x8] sm:$0xff]  ;;  %s244_s6 = smov [#allocation7]  }
  0x27   :  { %v40_v2 = vld [vmem:[#allocation2] sm:$0xff]  ;;  %v159_v3 = vpack.c.bf16 %v43_v1, %v42_v0  ;;  %v41_v4 = vld [vmem:[#allocation2 + $0x8] sm:$0xff]  ;;  %s133_s7 = sshll.u32 %s244_s6, 4  ;;  %s134_s7 = int_to_ptr.vmem [resolvable:$true] %s133_s7 }
  0x28   :  { %156 = vmatprep.mubr.msk.f32.mxu0 %vm44_vm0, %v40_v2  ;;  %s212_s1 = scalar_lea.vmem %s134_s7, 256  ;;  %p217_p3 = scmp.lt.s32.totalorder %s134_s7, %s134_s7 }
  0x29   :  { %160 = vmatprep.subr.bf16.mxu0 %v159_v3  ;;  %p213_p2 = scmp.ne.s32.totalorder %s134_s7, %s212_s1  ;;  %p218_p4 = scmp.lt.s32.totalorder %s212_s1, %s212_s1 }
  0x2a   :  { %162 = vmatpush3.bf16.msra.mxu0 %v159_v3 }
  0x2b   :  { %p219_p5 = por %p218_p4, %p217_p3 }
  0x2d   :  { %157 = vmatmul.mubr.msk.f32.vlgmr.msra.gmra.mrb[0].mxu0 %vm44_vm0, %v41_v4  ;;  %p220_p6 = pnand %p219_p5, %p213_p2 }
 0x100   :  { %v158_v5 = vpop.f32.mrb[0].mxu0 }
 0x101   :  { %127 = vst [vmem:[#allocation7 + $0x8] sm:$0xff] %v158_v5  ;;  %v117_v6 = vpop.f32.mrb[1].mxu0 }
 0x102   :  { %126 = vst [vmem:[#allocation7] sm:$0xff] %v117_v6 }
 0x103   :  { %223 = shalt.err (!%p220_p6)
}
 0x104   :  { %s224_s10 = scalar_lea.hbm %s307_s2, 256 }
 0x105   :  { %p225_p7 = scmp.ne.s32.totalorder %s307_s2, %s224_s10  ;;  %p228_p8 = scmp.lt.u32.totalorder %s224_s10, %s307_s2 }
 0x107   :  { %p230_p9 = pnand %p228_p8, %p225_p7 }
 0x109   :  { %233 = shalt.err (!%p230_p9)
}
 0x10a   :  { %139 = dma.vmem_to_hbm [thread:$0]  %s134_s7, 256, %s307_s2, [#allocation4], %s241_s19, %s241_s19, %s242_s20  }
 0x10b   :  { %238 = dma.done.wait [#allocation4], 256  }
 0x10c   :  { %239 = vsyncadd [#allocation4], 4294967040 }
 0x10d   :  { %143 = vsyncpa [#allocation3], 1 }
 0x10e   :  { %144 = vsyncpa [#allocation6], 1 }
 0x10f   :  { %145 = vsyncpa [#allocation4], 1 }

</bundles_post_ra>
